<compile_context>
chip_gen: v6e
topology: v6e:2x2x1
jax: 0.10.0
libtpu: 0.0.40
codegen_flags: <defaults>
</compile_context>

<pallas_src>
import functools
import math

import jax
import jax.numpy as jnp
from jax.experimental import pallas as pl
from jax.experimental.pallas import tpu as pltpu


def _actor_head_kernel(x_ref, w1_ref, b1_ref, w2_ref, b2_ref, out_ref, *, compute_dtype):
    # x_ref : (TM, D) native dtype      w1_ref: (D, D) compute dtype (resident)
    # b1_ref: (1, D) f32 (resident)     w2_ref: (1, D) f32 (resident)
    # b2_ref: (1,)  f32 in SMEM         out_ref: (TM, 1)
    x = x_ref[...].astype(compute_dtype)            # VPU cast, hidden under DMA
    h = jnp.dot(x, w1_ref[...], preferred_element_type=jnp.float32)
    h = jnp.maximum(h + b1_ref[...], 0.0)           # Linear + ReLU (f32)
    # Second projection has N=1: keep it off the MXU (VPU mul + XLU lane reduce).
    logits = jnp.sum(h * w2_ref[...], axis=-1, keepdims=True) + b2_ref[0]
    out_ref[...] = logits.astype(out_ref.dtype)


def _round_up(x, m):
    return ((x + m - 1) // m) * m


def _choose_row_tile(m, tm):
    """Row tile: big enough to amortize per-grid-step overhead (~0.35 us),
    a multiple of 128 rows (so partial last blocks stay layout-legal), and
    leaving >= 2 grid steps on large problems so both v7x TensorCores get work.
    Small problems use a single full-extent block (always legal)."""
    if m <= 1024:
        return m
    tm = _round_up(max(256, min(int(tm), 4096)), 128)
    return min(tm, _round_up(pl.cdiv(m, 2), 128))


def actor_forward(state_embeddings, params, *, tm=2048, compute_dtype=jnp.bfloat16):
    """Pallas implementation of Actor.forward.

    state_embeddings: [..., embedding_dim] (e.g. [batch, num_nodes, D])
    returns: logits with shape state_embeddings.shape[:-1]
    """
    w1, b1, w2, b2 = params["w1"], params["b1"], params["w2"], params["b2"]
    D = state_embeddings.shape[-1]
    assert w1.shape == (D, D) and w2.shape == (D, 1)

    lead_shape = state_embeddings.shape[:-1]
    x = state_embeddings.reshape(-1, D)             # no dtype cast: stream x once
    M = x.shape[0]

    tm_eff = _choose_row_tile(M, tm)
    grid = (pl.cdiv(M, tm_eff),)

    # Small, one-time parameter prep (W1 in compute dtype; biases / W2 row in f32).
    w1_c = w1.astype(compute_dtype)
    b1_row = b1.reshape(1, D).astype(jnp.float32)
    w2_row = w2.reshape(1, D).astype(jnp.float32)   # (D,1) -> (1,D), order preserved
    b2_s = b2.reshape(1).astype(jnp.float32)

    kernel = functools.partial(_actor_head_kernel, compute_dtype=compute_dtype)

    out = pl.pallas_call(
        kernel,
        out_shape=jax.ShapeDtypeStruct((M, 1), state_embeddings.dtype),
        grid_spec=pltpu.PrefetchScalarGridSpec(
            num_scalar_prefetch=0,
            grid=grid,
            in_specs=[
                pl.BlockSpec((tm_eff, D), lambda i: (i, 0)),        # x row tile (streamed)
                pl.BlockSpec((D, D), lambda i: (0, 0)),             # W1 (VMEM resident)
                pl.BlockSpec((1, D), lambda i: (0, 0)),             # b1
                pl.BlockSpec((1, D), lambda i: (0, 0)),             # W2 as a row
                pl.BlockSpec(memory_space=pltpu.MemorySpace.SMEM),  # b2 scalar
            ],
            out_specs=pl.BlockSpec((tm_eff, 1), lambda i: (i, 0)),
        ),
        compiler_params=pltpu.CompilerParams(
            dimension_semantics=("parallel",),
        ),
    )(x, w1_c, b1_row, w2_row, b2_s)

    return out.reshape(lead_shape)


def init_actor_params(key, embedding_dim=128, dtype=jnp.float32):
    """Deterministic init matching nn.Linear default (uniform ±1/sqrt(fan_in))."""
    k1, k2, k3, k4 = jax.random.split(key, 4)
    bound1 = 1.0 / math.sqrt(embedding_dim)
    w1 = jax.random.uniform(k1, (embedding_dim, embedding_dim), dtype,
                            minval=-bound1, maxval=bound1)
    b1 = jax.random.uniform(k2, (embedding_dim,), dtype, minval=-bound1, maxval=bound1)
    bound2 = 1.0 / math.sqrt(embedding_dim)
    w2 = jax.random.uniform(k3, (embedding_dim, 1), dtype,
                            minval=-bound2, maxval=bound2)
    b2 = jax.random.uniform(k4, (1,), dtype, minval=-bound2, maxval=bound2)
    return {"w1": w1, "b1": b1, "w2": w2, "b2": b2}


def actor_forward_ref(state_embeddings, params):
    """Pure-JAX f32 reference for correctness checking."""
    h = jnp.maximum(state_embeddings @ params["w1"] + params["b1"], 0.0)
    return (h @ params["w2"] + params["b2"])[..., 0]


if __name__ == "__main__":
    key = jax.random.PRNGKey(0)
    kp, kx1, kx2 = jax.random.split(key, 3)

    embedding_dim = 128          # module default
    params = init_actor_params(kp, embedding_dim=embedding_dim)

    # Small demo shape (single-block path).
    batch, num_nodes = 2, 8
    se_small = jax.random.normal(kx1, (batch, num_nodes, embedding_dim),
                                 dtype=jnp.float32)
    logits = jax.block_until_ready(actor_forward(se_small, params))
    ref = actor_forward_ref(se_small, params)
    assert logits.shape == (batch, num_nodes), logits.shape
    # bf16 MXU inputs (f32 accumulation): tolerance loosened vs f32 reference.
    assert jnp.allclose(logits, ref, atol=5e-2, rtol=5e-2), "small-shape mismatch"

    # Second check exercising the multi-step grid + partial last block path.
    se_big = jax.random.normal(kx2, (3, 513, embedding_dim), dtype=jnp.float32)
    logits_big = jax.block_until_ready(actor_forward(se_big, params))
    ref_big = actor_forward_ref(se_big, params)
    assert logits_big.shape == (3, 513), logits_big.shape
    assert jnp.allclose(logits_big, ref_big, atol=5e-2, rtol=5e-2), "tiled-path mismatch"

    print("KERNEL_OK")
</pallas_src>

<mosaic_0001>
module attributes {stable_mosaic.version = 11 : i64} {
  func.func @_actor_head_kernel(%arg0: i32, %arg1: memref<16x128xf32, #tpu.memory_space<vmem>>, %arg2: memref<128x128xbf16, #tpu.memory_space<vmem>>, %arg3: memref<1x128xf32, #tpu.memory_space<vmem>>, %arg4: memref<1x128xf32, #tpu.memory_space<vmem>>, %arg5: memref<1xf32, #tpu.memory_space<smem>>, %arg6: memref<16x1xf32, #tpu.memory_space<vmem>>) attributes {dimension_semantics = [#tpu.dimension_semantics<parallel>], iteration_bounds = array<i64: 1>, scalar_prefetch = 0 : i64, scratch_operands = 0 : i64, tpu.core_type = #tpu.core_type<tc>, window_params = [{transform_indices = @transform_0, window_bounds = array<i64: 16, 128>}, {pipeline_mode = #tpu.pipeline_mode<synchronous>, transform_indices = @transform_1, window_bounds = array<i64: 128, 128>}, {pipeline_mode = #tpu.pipeline_mode<synchronous>, transform_indices = @transform_2, window_bounds = array<i64: 1, 128>}, {pipeline_mode = #tpu.pipeline_mode<synchronous>, transform_indices = @transform_3, window_bounds = array<i64: 1, 128>}, {transform_indices = @transform_4, window_bounds = array<i64: 1>}, {transform_indices = @transform_5, window_bounds = array<i64: 16, 1>}]} {
    %c0 = arith.constant 0 : index
    %c0_0 = arith.constant 0 : index
    %0 = vector.load %arg1[%c0, %c0_0] : memref<16x128xf32, #tpu.memory_space<vmem>>, vector<16x128xf32>
    %1 = arith.truncf %0 : vector<16x128xf32> to vector<16x128xbf16>
    %c0_1 = arith.constant 0 : index
    %c0_2 = arith.constant 0 : index
    %2 = vector.load %arg2[%c0_1, %c0_2] : memref<128x128xbf16, #tpu.memory_space<vmem>>, vector<128x128xbf16>
    %cst = arith.constant dense<0.000000e+00> : vector<16x128xf32>
    %3 = tpu.matmul %1, %2, %cst {dimension_numbers = #tpu.dot_dimension_numbers<[1], [0], [0], [1], [0, 0, 1, 1], [], []>} : vector<16x128xbf16>, vector<128x128xbf16>, vector<16x128xf32> -> vector<16x128xf32>
    %c0_3 = arith.constant 0 : index
    %c0_4 = arith.constant 0 : index
    %4 = vector.load %arg3[%c0_3, %c0_4] : memref<1x128xf32, #tpu.memory_space<vmem>>, vector<1x128xf32>
    %5 = vector.broadcast %4 : vector<1x128xf32> to vector<16x128xf32>
    %6 = arith.addf %3, %5 : vector<16x128xf32>
    %cst_5 = arith.constant 0.000000e+00 : f32
    %7 = vector.broadcast %cst_5 : f32 to vector<16x128xf32>
    %8 = arith.maximumf %6, %7 : vector<16x128xf32>
    %c0_6 = arith.constant 0 : index
    %c0_7 = arith.constant 0 : index
    %9 = vector.load %arg4[%c0_6, %c0_7] : memref<1x128xf32, #tpu.memory_space<vmem>>, vector<1x128xf32>
    %10 = vector.broadcast %9 : vector<1x128xf32> to vector<16x128xf32>
    %11 = arith.mulf %8, %10 : vector<16x128xf32>
    %cst_8 = arith.constant dense<0.000000e+00> : vector<16xf32>
    %12 = vector.multi_reduction <add>, %11, %cst_8 [1] : vector<16x128xf32> to vector<16xf32>
    %13 = vector.shape_cast %12 : vector<16xf32> to vector<16x1xf32>
    %c0_9 = arith.constant 0 : index
    %14 = memref.load %arg5[%c0_9] : memref<1xf32, #tpu.memory_space<smem>>
    %15 = vector.broadcast %14 : f32 to vector<16x1xf32>
    %16 = arith.addf %13, %15 : vector<16x1xf32>
    %c0_10 = arith.constant 0 : index
    %c0_11 = arith.constant 0 : index
    %17 = vector.load %arg6[%c0_10, %c0_11] : memref<16x1xf32, #tpu.memory_space<vmem>>, vector<16x1xf32>
    tpu.vector_store %arg6[%c0_10, %c0_11], %16 {strides = array<i32>} : memref<16x1xf32, #tpu.memory_space<vmem>>, vector<16x1xf32>,
    return
  }
  func.func @transform_0(%arg0: i32) -> (i32, i32) {
    %c0_i32 = arith.constant 0 : i32
    %c0_i32_0 = arith.constant 0 : i32
    return %arg0, %c0_i32 : i32, i32
  }
  func.func @transform_1(%arg0: i32) -> (i32, i32) {
    %c0_i32 = arith.constant 0 : i32
    %c0_i32_0 = arith.constant 0 : i32
    %c0_i32_1 = arith.constant 0 : i32
    return %c0_i32, %c0_i32_0 : i32, i32
  }
  func.func @transform_2(%arg0: i32) -> (i32, i32) {
    %c0_i32 = arith.constant 0 : i32
    %c0_i32_0 = arith.constant 0 : i32
    %c0_i32_1 = arith.constant 0 : i32
    return %c0_i32, %c0_i32_0 : i32, i32
  }
  func.func @transform_3(%arg0: i32) -> (i32, i32) {
    %c0_i32 = arith.constant 0 : i32
    %c0_i32_0 = arith.constant 0 : i32
    %c0_i32_1 = arith.constant 0 : i32
    return %c0_i32, %c0_i32_0 : i32, i32
  }
  func.func @transform_4(%arg0: i32) -> i32 {
    %c0_i32 = arith.constant 0 : i32
    %c0_i32_0 = arith.constant 0 : i32
    return %c0_i32 : i32
  }
  func.func @transform_5(%arg0: i32) -> (i32, i32) {
    %c0_i32 = arith.constant 0 : i32
    %c0_i32_0 = arith.constant 0 : i32
    return %arg0, %c0_i32 : i32, i32
  }
}

</mosaic_0001>

<bundles_post_ra>
// kernel: tpu_custom_call.1
= control target key start
LH: loop header
LB: loop body
LE: loop exit
PB: predicated region body
PF: predicated region fallthrough
CT: control target
= control target key end

     0   :  { %11 = vsyncpa [#allocation4], 0  ;;  %s351_s0 = inlined_call_operand.hbm [shape: f32[16,128], index: 0, kind: input, shape index: {}]   ;;  %s352_s1 = inlined_call_operand.hbm [shape: bf16[128,128], index: 1, kind: input, shape index: {}]   ;;  %s353_s2 = inlined_call_operand.vmem [shape: f32[1,128], index: 2, kind: input, shape index: {}]   ;;  %s354_s3 = inlined_call_operand.vmem [shape: f32[1,128], index: 3, kind: input, shape index: {}]   ;;  %s355_s4 = inlined_call_operand.<no memory space> [shape: f32[1], index: 4, kind: input, shape index: {}]   ;;  %s356_s5 = inlined_call_operand.vmem [shape: f32[16,1], index: 5, kind: output, shape index: {}]  }
   0x1   :  { %12 = vsyncpa [#allocation6], 0  ;;  %s292_s18 = smov [#allocation3]  }
   0x2   :  { %s18_s19 = sshll.u32 %s292_s18, 4  ;;  %s19_s19 = int_to_ptr.vmem [resolvable:$true] %s18_s19 }
   0x3   :  { %s256_s20 = scalar_lea.vmem %s19_s19, 256  ;;  %p261_p1 = scmp.lt.s32.totalorder %s19_s19, %s19_s19 }
   0x4   :  { %p257_p0 = scmp.ne.s32.totalorder %s19_s19, %s256_s20  ;;  %p262_p2 = scmp.lt.s32.totalorder %s256_s20, %s256_s20 }
   0x6   :  { %p263_p3 = por %p262_p2, %p261_p1 }
   0x8   :  { %p264_p4 = pnand %p263_p3, %p257_p0 }
   0xa   :  { %267 = shalt.err (!%p264_p4)
}
   0xb   :  { %s293_s21 = smov 128   ;;  %s294_s22 = smov 8  }
   0xc   :  { %24 = dma.hbm_to_vmem [thread:$0]  %s351_s0, 256, %s19_s19, [#allocation4], %s293_s21, %s293_s21, %s294_s22  }
   0xd   :  { %s295_s25 = smov [#allocation5]  }
   0xe   :  { %s30_s26 = sshll.u32 %s295_s25, 4  ;;  %s31_s26 = int_to_ptr.vmem [resolvable:$true] %s30_s26 }
   0xf   :  { %s276_s27 = scalar_lea.vmem %s31_s26, 1024  ;;  %p281_p6 = scmp.lt.s32.totalorder %s31_s26, %s31_s26 }
  0x10   :  { %p277_p5 = scmp.ne.s32.totalorder %s31_s26, %s276_s27  ;;  %p282_p7 = scmp.lt.s32.totalorder %s276_s27, %s276_s27 }
  0x12   :  { %p283_p8 = por %p282_p7, %p281_p6 }
  0x14   :  { %p284_p9 = pnand %p283_p8, %p277_p5 }
  0x16   :  { %287 = shalt.err (!%p284_p9)
}
  0x17   :  { %s296_s28 = smov 64   ;;  %s297_s29 = smov 4  }
  0x18   :  { %36 = dma.hbm_to_vmem [thread:$0]  %s352_s1, 1024, %s31_s26, [#allocation6], %s296_s28, %s296_s28, %s297_s29  }
  0x19   :  { %288 = dma.done.wait [#allocation4], 256  }
  0x1a   :  { %289 = vsyncadd [#allocation4], 4294967040 }
  0x1b   :  { %290 = dma.done.wait [#allocation6], 1024  }
  0x1c   :  { %291 = vsyncadd [#allocation6], 4294966272  ;;  %v298_v0 = vmov 0.0   ;;  %vm299_vm0 = vmmov 0   ;;  %v240_v1 = vld [vmem:[#allocation5 + $0x38] sm:$0xff]   ;;  %v241_v2 = vld [vmem:[#allocation5 + $0x30] sm:$0xff]   ;;  %v181_v24 = vstv %s355_s4 }
  0x1d   :  { %212 = vmatprep.subr.bf16.mxu0 %v298_v0  ;;  %228 = vmatprep.mubr.msk.bf16.mxu0 %vm299_vm0, %v298_v0  ;;  %v242_v3 = vld [vmem:[#allocation5 + $0x28] sm:$0xff]   ;;  %v243_v4 = vld [vmem:[#allocation5 + $0x20] sm:$0xff]   ;;  %v244_v5 = vld [vmem:[#allocation5 + $0x18] sm:$0xff]   ;;  %vm184_vm1 = vcmask 7168  }
  0x1e   :  { %213 = vmatpush3.bf16.msra.mxu0 %v240_v1  ;;  %v245_v6 = vld [vmem:[#allocation5 + $0x10] sm:$0xff]   ;;  %v246_v7 = vld [vmem:[#allocation5 + $0x8] sm:$0xff]   ;;  %v247_v8 = vld [vmem:[#allocation5] sm:$0xff]  }
  0x1f   :  { %214 = vmatprep.subr.bf16.mxu0 %v298_v0  ;;  %v50_v9 = vld [vmem:[#allocation3] sm:$0xff]  ;;  %v51_v10 = vld [vmem:[#allocation3 + $0x8] sm:$0xff] }
  0x20   :  { %v52_v11 = vpack.c.bf16 %v51_v10, %v50_v9  ;;  %v193_v12 = vld [vmem:[%s353_s2] ss:$0 sm:$0xff] }
  0x21   :  { %v202_v16 = vld [vmem:[%s354_s3] ss:$0 sm:$0xff] }
  0x22   :  { %215 = vmatpush3.bf16.msra.mxu0 %v241_v2 }
  0x23   :  { %216 = vmatprep.subr.bf16.mxu0 %v298_v0 }
  0x26   :  { %217 = vmatpush3.bf16.msra.mxu0 %v242_v3 }
  0x27   :  { %218 = vmatprep.subr.bf16.mxu0 %v298_v0 }
  0x2a   :  { %219 = vmatpush3.bf16.msra.mxu0 %v243_v4 }
  0x2b   :  { %220 = vmatprep.subr.bf16.mxu0 %v298_v0 }
  0x2e   :  { %221 = vmatpush3.bf16.msra.mxu0 %v244_v5 }
  0x2f   :  { %222 = vmatprep.subr.bf16.mxu0 %v298_v0 }
  0x32   :  { %223 = vmatpush3.bf16.msra.mxu0 %v245_v6 }
  0x33   :  { %224 = vmatprep.subr.bf16.mxu0 %v298_v0 }
  0x36   :  { %225 = vmatpush3.bf16.msra.mxu0 %v246_v7 }
  0x37   :  { %226 = vmatprep.subr.bf16.mxu0 %v298_v0 }
  0x3a   :  { %227 = vmatpush3.bf16.msra.mxu0 %v247_v8 }
  0x3d   :  { %229 = vmatmul.mubr.bf16.vlgmr.msra.gmra.mxu0 %v52_v11 }
  0xfd   :  { %v158_v13 = vpop.f32.mrf.mxu0 }
  0xfe   :  { %v159_v14 = vadd.f32 %v193_v12, %v158_v13 }
  0xff   :  { %v230_v15 = vpop.f32.mrf.mxu0 }
 0x100   :  { %v165_v17 = vmax.f32 %v159_v14, 0.0 }
 0x101   :  { %v161_v18 = vpop.f32.mrf.mxu0 }
 0x102   :  { %v162_v19 = vadd.f32 %v193_v12, %v161_v18  ;;  %v174_v20 = vmul.f32 %v202_v16, %v165_v17 }
 0x103   :  { %v231_v21 = vpop.f32.mrf.mxu0 }
 0x104   :  { %v166_v22 = vmax.f32 %v162_v19, 0.0  ;;  %176 = vadd.xlane.f32.xlu0 %v174_v20 }
 0x106   :  { %v175_v23 = vmul.f32 %v202_v16, %v166_v22 }
 0x108   :  { %178 = vadd.xlane.f32.xlu0 %v175_v23 }
 0x18d   :  { %v177_v25 = vpop.xlane.xlu0 %176 }
 0x18e   :  { %v182_v26 = vadd.f32 %v181_v24, %v177_v25 }
 0x190   :  { %185 = vst.msk [vmem:[%s356_s5] sm:$0xff] %vm184_vm1, %v182_v26 }
 0x191   :  { %v179_v27 = vpop.xlane.xlu0 %178 }
 0x192   :  { %v183_v28 = vadd.f32 %v181_v24, %v179_v27 }
 0x194   :  { %186 = vst.msk [vmem:[%s356_s5 + $0x8] sm:$0xff] %vm184_vm1, %v183_v28 }
 0x195   :  { %191 = vsyncpa [#allocation4], 1 }
 0x196   :  { %192 = vsyncpa [#allocation6], 1 }

</bundles_post_ra>
